<compile_context>
chip_gen: v5e
topology: v5e:2x2
jax: 0.10.0
libtpu: 0.0.40
codegen_flags: <defaults>
</compile_context>

<pallas_src>
import functools

import jax
import jax.numpy as jnp
from jax import lax
from jax.experimental import pallas as pl
from jax.experimental.pallas import tpu as pltpu


def _round_up(x, m):
    return ((x + m - 1) // m) * m


def _falkon_kernel(x_ref, xn_ref, z_ref, zn_ref, a_ref, o_ref, *, tm, resident, k_dtype):
    j = pl.program_id(1)

    @pl.when(j == 0)
    def _():
        o_ref[...] = jnp.zeros_like(o_ref)

    if resident:
        # Z / alpha live fully in VMEM; select the current M tile by slicing.
        off = pl.multiple_of(j * tm, tm)
        z = z_ref[pl.ds(off, tm), :]      # (tm, Dp)
        a = a_ref[pl.ds(off, tm), :]      # (tm, Tp)
    else:
        z = z_ref[...]
        a = a_ref[...]

    x = x_ref[...]                        # (tn, Dp), pre-scaled by 1/sigma

    # pairwise squared distances: ||x||^2 + ||z||^2 - 2 x.z  (norms precomputed)
    s = lax.dot_general(x, z, dimension_numbers=(((1,), (1,)), ((), ())),
                        preferred_element_type=jnp.float32)      # (tn, tm) on MXU
    sqd = jnp.maximum(xn_ref[...] + zn_ref[...] - 2.0 * s, 0.0)
    k = jnp.exp(-0.5 * sqd).astype(k_dtype)                       # Gaussian kernel block

    o_ref[...] += jnp.dot(k, a, preferred_element_type=jnp.float32)


def falkon_predict(X, Z, alpha, sigma, *, tn=256, tm=256,
                   resident_vmem_budget=40 * 2**20, use_bf16_kernel=False):
    """out[i, t] = sum_m exp(-0.5 * ||(X[i]-Z[m]) / sigma||^2) * alpha[m, t]"""
    N, D = X.shape
    M, T = alpha.shape
    assert Z.shape == (M, D)

    # glue: per-feature length-scale scaling (sigma: scalar or (D,))
    inv_sigma = (1.0 / jnp.asarray(sigma, jnp.float32)).reshape(-1)
    Xs = X.astype(jnp.float32) * inv_sigma
    Zs = Z.astype(jnp.float32) * inv_sigma

    # hoist row norms out of the hot loop
    xn = jnp.sum(Xs * Xs, axis=-1, keepdims=True)            # (N, 1)
    zn = jnp.sum(Zs * Zs, axis=-1)[None, :]                   # (1, M)

    # tile sizes (clamped for small problems) + lane/sublane friendly padding
    tn = int(min(tn, _round_up(N, 8)))
    tm = int(min(tm, _round_up(M, 128)))
    Np, Mp = _round_up(N, tn), _round_up(M, tm)
    Dp, Tp = _round_up(D, 128), _round_up(T, 128)

    k_dtype = jnp.bfloat16 if use_bf16_kernel else jnp.float32

    Xp = jnp.zeros((Np, Dp), jnp.float32).at[:N, :D].set(Xs)
    Zp = jnp.zeros((Mp, Dp), jnp.float32).at[:M, :D].set(Zs)
    Ap = jnp.zeros((Mp, Tp), k_dtype).at[:M, :T].set(alpha.astype(k_dtype))
    Xn = jnp.zeros((Np, 1), jnp.float32).at[:N].set(xn)
    Zn = jnp.zeros((1, Mp), jnp.float32).at[:, :M].set(zn)
    # padded alpha rows/cols are zero => padded Nystrom centers / targets contribute nothing.

    grid = (Np // tn, Mp // tm)

    a_bytes = 2 if use_bf16_kernel else 4
    resident_bytes = 2 * (4 * Mp * Dp + a_bytes * Mp * Tp)    # Z + alpha, double-buffered
    resident = resident_bytes <= resident_vmem_budget

    if resident:
        z_spec = pl.BlockSpec((Mp, Dp), lambda i, j: (0, 0))  # DMA'd once, stays in VMEM
        a_spec = pl.BlockSpec((Mp, Tp), lambda i, j: (0, 0))
    else:
        z_spec = pl.BlockSpec((tm, Dp), lambda i, j: (j, 0))  # streamed per M tile
        a_spec = pl.BlockSpec((tm, Tp), lambda i, j: (j, 0))

    # explicit VMEM budget (<= 56 MiB so it also fits v7x's 64 MiB physical VMEM)
    per_step = 2 * 4 * (tn * Dp + tn + tm + tn * Tp)
    est = per_step + (resident_bytes if resident
                      else 2 * (4 * tm * Dp + a_bytes * tm * Tp))
    vmem_limit = int(min(max(est + (16 << 20), 32 << 20), 56 << 20))

    out = pl.pallas_call(
        functools.partial(_falkon_kernel, tm=tm, resident=resident, k_dtype=k_dtype),
        out_shape=jax.ShapeDtypeStruct((Np, Tp), jnp.float32),
        grid_spec=pltpu.PrefetchScalarGridSpec(
            num_scalar_prefetch=0,
            grid=grid,
            in_specs=[
                pl.BlockSpec((tn, Dp), lambda i, j: (i, 0)),   # X tile
                pl.BlockSpec((tn, 1), lambda i, j: (i, 0)),    # ||x||^2 tile
                z_spec,                                        # Z (resident or streamed)
                pl.BlockSpec((1, tm), lambda i, j: (0, j)),    # ||z||^2 tile (tiny, streamed)
                a_spec,                                        # alpha (resident or streamed)
            ],
            out_specs=pl.BlockSpec((tn, Tp), lambda i, j: (i, 0)),
        ),
        compiler_params=pltpu.CompilerParams(
            dimension_semantics=("parallel", "arbitrary"),
            vmem_limit_bytes=vmem_limit,
        ),
    )(Xp, Xn, Zp, Zn, Ap)

    return out[:N, :T]


def falkon_predict_ref(X, Z, alpha, sigma):
    Xs = X / sigma
    Zs = Z / sigma
    sqd = (jnp.sum(Xs * Xs, -1, keepdims=True)
           + jnp.sum(Zs * Zs, -1, keepdims=True).T
           - 2.0 * Xs @ Zs.T)
    return jnp.exp(-0.5 * jnp.maximum(sqd, 0.0)) @ alpha


if __name__ == "__main__":
    key = jax.random.PRNGKey(0)
    kx, kz, ka, kx2, kz2, ka2 = jax.random.split(key, 6)

    # N test pts, M Nystrom centers, D features, T targets
    N, M, D, T = 128, 64, 16, 8
    X = jax.random.normal(kx, (N, D), dtype=jnp.float32)
    Z = jax.random.normal(kz, (M, D), dtype=jnp.float32)       # "fitted" Nystrom centers
    alpha = jax.random.normal(ka, (M, T), dtype=jnp.float32)   # "fitted" dual coefficients
    sigma = jnp.full((D,), 2.0, dtype=jnp.float32)             # kernel.sigma.view(-1,1) -> per-dim

    # TODO(synk): Falkon fit() (preconditioned CG training) is not a forward-pass
    # op; only predict() (the forward) is implemented here with synthetic alpha/Z.

    ref = falkon_predict_ref(X, Z, alpha, sigma)

    # 1) default path (Z/alpha resident in VMEM)
    out = jax.block_until_ready(falkon_predict(X, Z, alpha, sigma))
    assert out.shape == (N, T)
    assert jnp.allclose(out, ref, atol=1e-4, rtol=1e-4)

    # 2) streamed-Z fallback path (forced)
    out_s = jax.block_until_ready(
        falkon_predict(X, Z, alpha, sigma, resident_vmem_budget=0))
    assert jnp.allclose(out_s, ref, atol=1e-4, rtol=1e-4)

    # 3) non-divisible / tiny shapes exercise the padding logic
    N2, M2, D2, T2 = 200, 150, 7, 3
    X2 = jax.random.normal(kx2, (N2, D2), dtype=jnp.float32)
    Z2 = jax.random.normal(kz2, (M2, D2), dtype=jnp.float32)
    a2 = jax.random.normal(ka2, (M2, T2), dtype=jnp.float32)
    s2 = jnp.full((D2,), 1.5, dtype=jnp.float32)
    out2 = jax.block_until_ready(falkon_predict(X2, Z2, a2, s2))
    assert jnp.allclose(out2, falkon_predict_ref(X2, Z2, a2, s2), atol=1e-4, rtol=1e-4)

    # 4) optional bf16 kernel-block matmul (v6e/v7x EUP/MXU lever); looser tolerance
    out_bf = jax.block_until_ready(
        falkon_predict(X, Z, alpha, sigma, use_bf16_kernel=True))
    assert jnp.allclose(out_bf, ref, atol=5e-2, rtol=5e-2)

    print("KERNEL_OK")
</pallas_src>

<mosaic_0001>
module attributes {stable_mosaic.version = 11 : i64} {
  func.func @_falkon_kernel(%arg0: i32, %arg1: i32, %arg2: memref<128x128xf32, #tpu.memory_space<vmem>>, %arg3: memref<128x1xf32, #tpu.memory_space<vmem>>, %arg4: memref<128x128xf32, #tpu.memory_space<vmem>>, %arg5: memref<1x128xf32, #tpu.memory_space<vmem>>, %arg6: memref<128x128xf32, #tpu.memory_space<vmem>>, %arg7: memref<128x128xf32, #tpu.memory_space<vmem>>) attributes {dimension_semantics = [#tpu.dimension_semantics<parallel>, #tpu.dimension_semantics<arbitrary>], iteration_bounds = array<i64: 1, 1>, scalar_prefetch = 0 : i64, scratch_operands = 0 : i64, tpu.core_type = #tpu.core_type<tc>, window_params = [{transform_indices = @transform_0, window_bounds = array<i64: 128, 128>}, {transform_indices = @transform_1, window_bounds = array<i64: 128, 1>}, {pipeline_mode = #tpu.pipeline_mode<synchronous>, transform_indices = @transform_2, window_bounds = array<i64: 128, 128>}, {transform_indices = @transform_3, window_bounds = array<i64: 1, 128>}, {pipeline_mode = #tpu.pipeline_mode<synchronous>, transform_indices = @transform_4, window_bounds = array<i64: 128, 128>}, {transform_indices = @transform_5, window_bounds = array<i64: 128, 128>}]} {
    %c0_i32 = arith.constant 0 : i32
    %0 = arith.cmpi eq, %arg1, %c0_i32 : i32
    %1 = arith.extui %0 : i1 to i32
    %c0_i32_0 = arith.constant 0 : i32
    %2 = arith.cmpi ne, %1, %c0_i32_0 : i32
    scf.if %2 {
      %cst_16 = arith.constant 0.000000e+00 : f32
      %28 = vector.broadcast %cst_16 : f32 to vector<128x128xf32>
      %c0_17 = arith.constant 0 : index
      %c0_18 = arith.constant 0 : index
      %29 = vector.load %arg7[%c0_17, %c0_18] : memref<128x128xf32, #tpu.memory_space<vmem>>, vector<128x128xf32>
      tpu.vector_store %arg7[%c0_17, %c0_18], %28 {strides = array<i32>} : memref<128x128xf32, #tpu.memory_space<vmem>>, vector<128x128xf32>,
    } else {
    }
    %c128_i32 = arith.constant 128 : i32
    %3 = arith.muli %arg1, %c128_i32 : i32
    %4 = tpu.assume_multiple %3, 128 : i32
    %5 = arith.index_cast %4 : i32 to index
    %c0 = arith.constant 0 : index
    %6 = vector.load %arg4[%5, %c0] : memref<128x128xf32, #tpu.memory_space<vmem>>, vector<128x128xf32>
    %7 = arith.index_cast %4 : i32 to index
    %c0_1 = arith.constant 0 : index
    %8 = vector.load %arg6[%7, %c0_1] : memref<128x128xf32, #tpu.memory_space<vmem>>, vector<128x128xf32>
    %c0_2 = arith.constant 0 : index
    %c0_3 = arith.constant 0 : index
    %9 = vector.load %arg2[%c0_2, %c0_3] : memref<128x128xf32, #tpu.memory_space<vmem>>, vector<128x128xf32>
    %cst = arith.constant dense<0.000000e+00> : vector<128x128xf32>
    %10 = tpu.matmul %9, %6, %cst {dimension_numbers = #tpu.dot_dimension_numbers<[1], [1], [0], [0], [0, 0, 1, 0], [], []>} : vector<128x128xf32>, vector<128x128xf32>, vector<128x128xf32> -> vector<128x128xf32>
    %c0_4 = arith.constant 0 : index
    %c0_5 = arith.constant 0 : index
    %11 = vector.load %arg3[%c0_4, %c0_5] : memref<128x1xf32, #tpu.memory_space<vmem>>, vector<128x1xf32>
    %c0_6 = arith.constant 0 : index
    %c0_7 = arith.constant 0 : index
    %12 = vector.load %arg5[%c0_6, %c0_7] : memref<1x128xf32, #tpu.memory_space<vmem>>, vector<1x128xf32>
    %13 = vector.broadcast %11 : vector<128x1xf32> to vector<128x128xf32>
    %14 = vector.broadcast %12 : vector<1x128xf32> to vector<128x128xf32>
    %15 = arith.addf %13, %14 : vector<128x128xf32>
    %cst_8 = arith.constant 2.000000e+00 : f32
    %16 = vector.broadcast %cst_8 : f32 to vector<128x128xf32>
    %17 = arith.mulf %16, %10 : vector<128x128xf32>
    %18 = arith.subf %15, %17 : vector<128x128xf32>
    %cst_9 = arith.constant 0.000000e+00 : f32
    %19 = vector.broadcast %cst_9 : f32 to vector<128x128xf32>
    %20 = arith.maximumf %18, %19 : vector<128x128xf32>
    %cst_10 = arith.constant -5.000000e-01 : f32
    %21 = vector.broadcast %cst_10 : f32 to vector<128x128xf32>
    %22 = arith.mulf %21, %20 : vector<128x128xf32>
    %23 = math.exp %22 : vector<128x128xf32>
    %c0_11 = arith.constant 0 : index
    %c0_12 = arith.constant 0 : index
    %24 = vector.load %arg7[%c0_11, %c0_12] : memref<128x128xf32, #tpu.memory_space<vmem>>, vector<128x128xf32>
    %cst_13 = arith.constant dense<0.000000e+00> : vector<128x128xf32>
    %25 = tpu.matmul %23, %8, %cst_13 {dimension_numbers = #tpu.dot_dimension_numbers<[1], [0], [0], [1], [0, 0, 1, 1], [], []>} : vector<128x128xf32>, vector<128x128xf32>, vector<128x128xf32> -> vector<128x128xf32>
    %26 = arith.addf %24, %25 : vector<128x128xf32>
    %c0_14 = arith.constant 0 : index
    %c0_15 = arith.constant 0 : index
    %27 = vector.load %arg7[%c0_14, %c0_15] : memref<128x128xf32, #tpu.memory_space<vmem>>, vector<128x128xf32>
    tpu.vector_store %arg7[%c0_14, %c0_15], %26 {strides = array<i32>} : memref<128x128xf32, #tpu.memory_space<vmem>>, vector<128x128xf32>,
    return
  }
  func.func @transform_0(%arg0: i32, %arg1: i32) -> (i32, i32) {
    %c0_i32 = arith.constant 0 : i32
    %c0_i32_0 = arith.constant 0 : i32
    return %arg0, %c0_i32 : i32, i32
  }
  func.func @transform_1(%arg0: i32, %arg1: i32) -> (i32, i32) {
    %c0_i32 = arith.constant 0 : i32
    %c0_i32_0 = arith.constant 0 : i32
    return %arg0, %c0_i32 : i32, i32
  }
  func.func @transform_2(%arg0: i32, %arg1: i32) -> (i32, i32) {
    %c0_i32 = arith.constant 0 : i32
    %c0_i32_0 = arith.constant 0 : i32
    %c0_i32_1 = arith.constant 0 : i32
    return %c0_i32, %c0_i32_0 : i32, i32
  }
  func.func @transform_3(%arg0: i32, %arg1: i32) -> (i32, i32) {
    %c0_i32 = arith.constant 0 : i32
    %c0_i32_0 = arith.constant 0 : i32
    return %c0_i32, %arg1 : i32, i32
  }
  func.func @transform_4(%arg0: i32, %arg1: i32) -> (i32, i32) {
    %c0_i32 = arith.constant 0 : i32
    %c0_i32_0 = arith.constant 0 : i32
    %c0_i32_1 = arith.constant 0 : i32
    return %c0_i32, %c0_i32_0 : i32, i32
  }
  func.func @transform_5(%arg0: i32, %arg1: i32) -> (i32, i32) {
    %c0_i32 = arith.constant 0 : i32
    %c0_i32_0 = arith.constant 0 : i32
    return %arg0, %c0_i32 : i32, i32
  }
}

</mosaic_0001>

<bundles_post_ra>
// kernel: tpu_custom_call.1
= control target key start
LH: loop header
LB: loop body
LE: loop exit
PB: predicated region body
PF: predicated region fallthrough
CT: control target
= control target key end

     0   :  { %10 = vsyncpa [#allocation3], 0  ;;  %s926_s0 = inlined_call_operand.vmem [shape: f32[128,128], index: 0, kind: input, shape index: {}]   ;;  %s927_s1 = inlined_call_operand.vmem [shape: f32[128,1], index: 1, kind: input, shape index: {}]   ;;  %s928_s2 = inlined_call_operand.hbm [shape: f32[128,128], index: 2, kind: input, shape index: {}]   ;;  %s929_s3 = inlined_call_operand.vmem [shape: f32[1,128], index: 3, kind: input, shape index: {}]   ;;  %s930_s4 = inlined_call_operand.hbm [shape: f32[128,128], index: 4, kind: input, shape index: {}]   ;;  %s931_s5 = inlined_call_operand.hbm [shape: f32[128,128], index: 5, kind: output, shape index: {}]  }
   0x1   :  { %11 = vsyncpa [#allocation6], 0 }
   0x2   :  { %12 = vsyncpa [#allocation4], 0  ;;  %s21_s20 = sshll.u32 %s928_s2, 4  ;;  %s719_s21 = smov [#allocation2]   ;;  %s22_s20 = int_to_ptr.hbm [resolvable:$true] %s21_s20 }
   0x3   :  { %s23_s22 = sshll.u32 %s719_s21, 4  ;;  %s36_s25 = sshll.u32 %s930_s4, 4  ;;  %s24_s22 = int_to_ptr.vmem [resolvable:$true] %s23_s22  ;;  %s37_s25 = int_to_ptr.hbm [resolvable:$true] %s36_s25 }
   0x4   :  { %s720_s26 = smov 128   ;;  %s721_s27 = smov 8  }
   0x5   :  { %29 = dma.hbm_to_vmem [thread:$0]  %s22_s20, 2048, %s24_s22, [#allocation3], %s720_s26, %s720_s26, %s721_s27  }
   0x6   :  { %s722_s28 = smov [#allocation5]  }
   0x7   :  { %s38_s29 = sshll.u32 %s722_s28, 4  ;;  %s39_s29 = int_to_ptr.vmem [resolvable:$true] %s38_s29 }
   0x8   :  { %44 = dma.hbm_to_vmem [thread:$0]  %s37_s25, 2048, %s39_s29, [#allocation6], %s720_s26, %s720_s26, %s721_s27  }
   0x9   :  { %713 = dma.done.wait [#allocation3], 2048  }
   0xa   :  { %714 = vsyncadd [#allocation3], 4294965248 }
   0xb   :  { %715 = dma.done.wait [#allocation6], 2048  }
   0xc   :  { %716 = vsyncadd [#allocation6], 4294965248  ;;  %v90_v0 = vld [vmem:[#allocation2 + $0x78] sm:$0xff]  ;;  %v89_v1 = vld [vmem:[#allocation2 + $0x70] sm:$0xff]  ;;  %v723_v7 = vmov 0   ;;  %s520_s20 = sshll.u32 %s931_s5, 4  ;;  %s521_s20 = int_to_ptr.hbm [resolvable:$true] %s520_s20 }
   0xd   :  { %124 = vmatpush.xpose.msra.mxu0 %v90_v0  ;;  %534 = vmatpush.xpose.msra.mxu2 %v90_v0  ;;  %v88_v2 = vld [vmem:[#allocation2 + $0x68] sm:$0xff]  ;;  %v87_v3 = vld [vmem:[#allocation2 + $0x60] sm:$0xff]  ;;  %v86_v4 = vld [vmem:[#allocation2 + $0x58] sm:$0xff] }
   0xe   :  { %535 = vmatpush.xpose.msra.mxu3 %v90_v0  ;;  %v191_v5 = vld [vmem:[%s927_s1 + $0x10] sm:$0xff]  ;;  %605 = vset.pattern.permute.xlu0 %v723_v7  ;;  %v84_v8 = vld [vmem:[#allocation2 + $0x48] sm:$0xff]  ;;  %v192_v9 = vld [vmem:[%s927_s1 + $0x18] sm:$0xff] }
   0xf   :  { %v85_v6 = vld [vmem:[#allocation2 + $0x50] sm:$0xff]  ;;  %218 = vperm.xlu0 %605, %v191_v5   ;;  %607 = vset.pattern.permute.xlu2 %v723_v7  ;;  %v83_v10 = vld [vmem:[#allocation2 + $0x40] sm:$0xff]  ;;  %v82_v11 = vld [vmem:[#allocation2 + $0x38] sm:$0xff] }
  0x10   :  { %606 = vset.pattern.permute.xlu1 %v723_v7  ;;  %v197_v12 = vld [vmem:[%s927_s1 + $0x40] sm:$0xff]  ;;  %v81_v13 = vld [vmem:[#allocation2 + $0x30] sm:$0xff]  ;;  %v80_v14 = vld [vmem:[#allocation2 + $0x28] sm:$0xff] }
  0x11   :  { %125 = vmatpush.xpose.msra.mxu0 %v89_v1  ;;  %536 = vmatpush.xpose.msra.mxu2 %v89_v1  ;;  %v195_v15 = vld [vmem:[%s927_s1 + $0x30] sm:$0xff]  ;;  %v193_v16 = vld [vmem:[%s927_s1 + $0x20] sm:$0xff]  ;;  %v78_v19 = vld [vmem:[#allocation2 + $0x18] sm:$0xff] }
  0x12   :  { %537 = vmatpush.xpose.msra.mxu3 %v89_v1  ;;  %v199_v17 = vld [vmem:[%s927_s1 + $0x50] sm:$0xff]  ;;  %v79_v18 = vld [vmem:[#allocation2 + $0x20] sm:$0xff]  ;;  %238 = vperm.xlu2 %607, %v195_v15   ;;  %v196_v20 = vld [vmem:[%s927_s1 + $0x38] sm:$0xff] }
  0x13   :  { %228 = vperm.xlu1 %606, %v193_v16   ;;  %v194_v21 = vld [vmem:[%s927_s1 + $0x28] sm:$0xff]  ;;  %v200_v22 = vld [vmem:[%s927_s1 + $0x58] sm:$0xff]  ;;  %v77_v23 = vld [vmem:[#allocation2 + $0x10] sm:$0xff] }
  0x14   :  { %v76_v24 = vld [vmem:[#allocation2 + $0x8] sm:$0xff]  ;;  %v201_v27 = vld [vmem:[%s927_s1 + $0x60] sm:$0xff]  ;;  %v203_v32 = vld [vmem:[%s927_s1 + $0x70] sm:$0xff] }
  0x15   :  { %126 = vmatpush.xpose.msra.mxu0 %v88_v2  ;;  %538 = vmatpush.xpose.msra.mxu2 %v88_v2  ;;  %v202_v25 = vld [vmem:[%s927_s1 + $0x68] sm:$0xff]  ;;  %v75_v28 = vld [vmem:[#allocation2] sm:$0xff]  ;;  %v114_v35 = vld [vmem:[%s926_s0 + $0x30] sm:$0xff] }
  0x16   :  { %539 = vmatpush.xpose.msra.mxu3 %v88_v2  ;;  %v198_v26 = vld [vmem:[%s927_s1 + $0x48] sm:$0xff]  ;;  %v108_v29 = vld [vmem:[%s926_s0] sm:$0xff]  ;;  %v204_v37 = vld [vmem:[%s927_s1 + $0x78] sm:$0xff] }
  0x17   :  { %223 = vperm.xlu0 %605, %v192_v9   ;;  %v113_v30 = vld [vmem:[%s926_s0 + $0x28] sm:$0xff]  ;;  %v120_v31 = vld [vmem:[%s926_s0 + $0x60] sm:$0xff]  ;;  %v110_v39 = vld [vmem:[%s926_s0 + $0x10] sm:$0xff] }
  0x18   :  { %v189_v33 = vld [vmem:[%s927_s1] sm:$0xff]  ;;  %v109_v34 = vld [vmem:[%s926_s0 + $0x8] sm:$0xff]  ;;  %v115_v40 = vld [vmem:[%s926_s0 + $0x38] sm:$0xff] }
  0x19   :  { %127 = vmatpush.xpose.msra.mxu0 %v87_v3  ;;  %540 = vmatpush.xpose.msra.mxu2 %v87_v3  ;;  %v121_v36 = vld [vmem:[%s926_s0 + $0x68] sm:$0xff]  ;;  %v122_v41 = vld [vmem:[%s926_s0 + $0x70] sm:$0xff]  ;;  %v111_v42 = vld [vmem:[%s926_s0 + $0x18] sm:$0xff] }
  0x1a   :  { %541 = vmatpush.xpose.msra.mxu3 %v87_v3  ;;  %243 = vperm.xlu2 %607, %v196_v20   ;;  %v190_v38 = vld [vmem:[%s927_s1 + $0x8] sm:$0xff]  ;;  %v116_v43 = vld [vmem:[%s926_s0 + $0x40] sm:$0xff]  ;;  %v123_v44 = vld [vmem:[%s926_s0 + $0x78] sm:$0xff] }
  0x1b   :  { %233 = vperm.xlu1 %606, %v194_v21   ;;  %v112_v45 = vld [vmem:[%s926_s0 + $0x20] sm:$0xff]  ;;  %v117_v46 = vld [vmem:[%s926_s0 + $0x48] sm:$0xff]  ;;  %v118_v47 = vld [vmem:[%s926_s0 + $0x50] sm:$0xff] }
  0x1c   :  { %v119_v48 = vld [vmem:[%s926_s0 + $0x58] sm:$0xff]  ;;  %v106_v50 = vld [vmem:[#allocation5 + $0x70] sm:$0xff]  ;;  %v105_v51 = vld [vmem:[#allocation5 + $0x68] sm:$0xff] }
  0x1d   :  { %128 = vmatpush.xpose.msra.mxu0 %v86_v4  ;;  %542 = vmatpush.xpose.msra.mxu2 %v86_v4  ;;  %v107_v49 = vld [vmem:[#allocation5 + $0x78] sm:$0xff]  ;;  %v104_v52 = vld [vmem:[#allocation5 + $0x60] sm:$0xff]  ;;  %v102_v54 = vld [vmem:[#allocation5 + $0x50] sm:$0xff] }
  0x1e   :  { %543 = vmatpush.xpose.msra.mxu3 %v86_v4  ;;  %566 = vmatpush.msra.mxu1 %v107_v49  ;;  %v103_v53 = vld [vmem:[#allocation5 + $0x58] sm:$0xff]  ;;  %v101_v55 = vld [vmem:[#allocation5 + $0x48] sm:$0xff]  ;;  %v100_v59 = vld [vmem:[#allocation5 + $0x40] sm:$0xff] }
  0x1f   :  { %248 = vperm.xlu0 %605, %v197_v12   ;;  %v99_v60 = vld [vmem:[#allocation5 + $0x38] sm:$0xff]  ;;  %v98_v61 = vld [vmem:[#allocation5 + $0x30] sm:$0xff]  ;;  %v97_v0 = vld [vmem:[#allocation5 + $0x28] sm:$0xff] }
  0x20   :  { %568 = vmatpush.msra.mxu1 %v106_v50  ;;  %v96_v1 = vld [vmem:[#allocation5 + $0x20] sm:$0xff]  ;;  %v95_v2 = vld [vmem:[#allocation5 + $0x18] sm:$0xff]  ;;  %v94_v3 = vld [vmem:[#allocation5 + $0x10] sm:$0xff] }
  0x21   :  { %129 = vmatpush.xpose.msra.mxu0 %v85_v6  ;;  %544 = vmatpush.xpose.msra.mxu2 %v85_v6  ;;  %v93_v4 = vld [vmem:[#allocation5 + $0x8] sm:$0xff]  ;;  %v92_v7 = vld [vmem:[#allocation5] sm:$0xff] }
  0x22   :  { %545 = vmatpush.xpose.msra.mxu3 %v85_v6  ;;  %273 = vperm.xlu2 %607, %v202_v25  }
  0x23   :  { %253 = vperm.xlu1 %606, %v198_v26   ;;  %570 = vmatpush.msra.mxu1 %v105_v51 }
  0x25   :  { %130 = vmatpush.xpose.msra.mxu0 %v84_v8  ;;  %546 = vmatpush.xpose.msra.mxu2 %v84_v8 }
  0x26   :  { %547 = vmatpush.xpose.msra.mxu3 %v84_v8  ;;  %572 = vmatpush.msra.mxu1 %v104_v52 }
  0x27   :  { %258 = vperm.xlu0 %605, %v199_v17  }
  0x28   :  { %574 = vmatpush.msra.mxu1 %v103_v53 }
  0x29   :  { %131 = vmatpush.xpose.msra.mxu0 %v83_v10  ;;  %548 = vmatpush.xpose.msra.mxu2 %v83_v10 }
  0x2a   :  { %549 = vmatpush.xpose.msra.mxu3 %v83_v10  ;;  %208 = vperm.xlu2 %607, %v189_v33  }
  0x2b   :  { %278 = vperm.xlu1 %606, %v203_v32   ;;  %576 = vmatpush.msra.mxu1 %v102_v54 }
  0x2d   :  { %132 = vmatpush.xpose.msra.mxu0 %v82_v11  ;;  %550 = vmatpush.xpose.msra.mxu2 %v82_v11 }
  0x2e   :  { %551 = vmatpush.xpose.msra.mxu3 %v82_v11  ;;  %578 = vmatpush.msra.mxu1 %v101_v55  ;;  %v882_v11 = vld [vmem:[%s929_s3] ss:$0 sm:$0xff]  ;;  %s724_s3 = smov [#allocation7]  }
  0x2f   :  { %263 = vperm.xlu0 %605, %v200_v22   ;;  %s518_s17 = sshll.u32 %s724_s3, 4  ;;  %s519_s17 = int_to_ptr.vmem [resolvable:$true] %s518_s17 }
  0x30   :  { %580 = vmatpush.msra.mxu1 %v100_v59 }
  0x31   :  { %133 = vmatpush.xpose.msra.mxu0 %v81_v13  ;;  %552 = vmatpush.xpose.msra.mxu2 %v81_v13 }
  0x32   :  { %553 = vmatpush.xpose.msra.mxu3 %v81_v13  ;;  %213 = vperm.xlu2 %607, %v190_v38  }
  0x33   :  { %283 = vperm.xlu1 %606, %v204_v37   ;;  %582 = vmatpush.msra.mxu1 %v99_v60 }
  0x35   :  { %134 = vmatpush.xpose.msra.mxu0 %v80_v14  ;;  %554 = vmatpush.xpose.msra.mxu2 %v80_v14 }
  0x36   :  { %555 = vmatpush.xpose.msra.mxu3 %v80_v14  ;;  %584 = vmatpush.msra.mxu1 %v98_v61 }
  0x37   :  { %268 = vperm.xlu0 %605, %v201_v27  }
  0x38   :  { %586 = vmatpush.msra.mxu1 %v97_v0 }
  0x39   :  { %135 = vmatpush.xpose.msra.mxu0 %v79_v18  ;;  %556 = vmatpush.xpose.msra.mxu2 %v79_v18 }
  0x3a   :  { %557 = vmatpush.xpose.msra.mxu3 %v79_v18  ;;  %588 = vmatpush.msra.mxu1 %v96_v1 }
  0x3c   :  { %590 = vmatpush.msra.mxu1 %v95_v2 }
  0x3d   :  { %136 = vmatpush.xpose.msra.mxu0 %v78_v19  ;;  %558 = vmatpush.xpose.msra.mxu2 %v78_v19 }
  0x3e   :  { %559 = vmatpush.xpose.msra.mxu3 %v78_v19  ;;  %592 = vmatpush.msra.mxu1 %v94_v3 }
  0x40   :  { %594 = vmatpush.msra.mxu1 %v93_v4 }
  0x41   :  { %137 = vmatpush.xpose.msra.mxu0 %v77_v23  ;;  %560 = vmatpush.xpose.msra.mxu2 %v77_v23 }
  0x42   :  { %561 = vmatpush.xpose.msra.mxu3 %v77_v23  ;;  %596 = vmatpush.msra.mxu1 %v92_v7 }
  0x45   :  { %138 = vmatpush.xpose.msra.mxu0 %v76_v24  ;;  %562 = vmatpush.xpose.msra.mxu2 %v76_v24 }
  0x46   :  { %563 = vmatpush.xpose.msra.mxu3 %v76_v24 }
  0x49   :  { %139 = vmatpush.xpose.msra.mxu0 %v75_v28  ;;  %564 = vmatpush.xpose.msra.mxu2 %v75_v28 }
  0x4a   :  { %565 = vmatpush.xpose.msra.mxu3 %v75_v28 }
  0x4c   :  { %140 = vmatmul.f32.vlgmr.msra.gmra.mxu0 %v108_v29  ;;  %155 = vmatmul.f32.vlgmr.msra.gmra.mxu2 %v113_v30 }
  0x4d   :  { %176 = vmatmul.f32.vlgmr.msra.gmra.mxu3 %v120_v31  ;;  %417 = vmatpush.msrb.mxu0 %v107_v49 }
  0x4e   :  { %567 = vmatpush.msrb.mxu3 %v107_v49 }
  0x4f   :  { %418 = vmatpush.msrb.mxu0 %v106_v50 }
  0x50   :  { %569 = vmatpush.msrb.mxu3 %v106_v50 }
  0x51   :  { %419 = vmatpush.msrb.mxu0 %v105_v51 }
  0x52   :  { %571 = vmatpush.msrb.mxu3 %v105_v51 }
  0x53   :  { %420 = vmatpush.msrb.mxu0 %v104_v52 }
  0x54   :  { %143 = vmatmul.f32.gmra.mxu0 %v109_v34  ;;  %158 = vmatmul.f32.gmra.mxu2 %v114_v35 }
  0x55   :  { %179 = vmatmul.f32.gmra.mxu3 %v121_v36  ;;  %421 = vmatpush.msrb.mxu0 %v103_v53 }
  0x56   :  { %573 = vmatpush.msrb.mxu3 %v104_v52 }
  0x57   :  { %422 = vmatpush.msrb.mxu0 %v102_v54 }
  0x58   :  { %575 = vmatpush.msrb.mxu3 %v103_v53 }
  0x59   :  { %423 = vmatpush.msrb.mxu0 %v101_v55 }
  0x5a   :  { %577 = vmatpush.msrb.mxu3 %v102_v54 }
  0x5b   :  { %424 = vmatpush.msrb.mxu0 %v100_v59 }
  0x5c   :  { %146 = vmatmul.f32.gmra.mxu0 %v110_v39  ;;  %161 = vmatmul.f32.gmra.mxu2 %v115_v40 }
  0x5d   :  { %182 = vmatmul.f32.gmra.mxu3 %v122_v41  ;;  %425 = vmatpush.msrb.mxu0 %v99_v60 }
  0x5e   :  { %579 = vmatpush.msrb.mxu3 %v101_v55 }
  0x5f   :  { %426 = vmatpush.msrb.mxu0 %v98_v61 }
  0x60   :  { %581 = vmatpush.msrb.mxu3 %v100_v59 }
  0x61   :  { %427 = vmatpush.msrb.mxu0 %v97_v0 }
  0x62   :  { %583 = vmatpush.msrb.mxu3 %v99_v60 }
  0x63   :  { %428 = vmatpush.msrb.mxu0 %v96_v1 }
  0x64   :  { %149 = vmatmul.f32.gmra.mxu0 %v111_v42  ;;  %164 = vmatmul.f32.gmra.mxu2 %v116_v43 }
  0x65   :  { %185 = vmatmul.f32.gmra.mxu3 %v123_v44  ;;  %429 = vmatpush.msrb.mxu0 %v95_v2 }
  0x66   :  { %585 = vmatpush.msrb.mxu3 %v98_v61 }
  0x67   :  { %430 = vmatpush.msrb.mxu0 %v94_v3 }
  0x68   :  { %587 = vmatpush.msrb.mxu3 %v97_v0 }
  0x69   :  { %431 = vmatpush.msrb.mxu0 %v93_v4 }
  0x6a   :  { %589 = vmatpush.msrb.mxu3 %v96_v1 }
  0x6b   :  { %432 = vmatpush.msrb.mxu0 %v92_v7 }
  0x6c   :  { %152 = vmatmul.f32.gmra.mxu0 %v112_v45  ;;  %167 = vmatmul.f32.gmra.mxu2 %v117_v46  ;;  %v867_v58 = vpop.permute.xlu2 %238 }
  0x6d   :  { %591 = vmatpush.msrb.mxu3 %v95_v2 }
  0x6f   :  { %593 = vmatpush.msrb.mxu3 %v94_v3 }
  0x71   :  { %595 = vmatpush.msrb.mxu3 %v93_v4 }
  0x73   :  { %597 = vmatpush.msrb.mxu3 %v92_v7 }
  0x74   :  { %170 = vmatmul.f32.gmra.mxu2 %v118_v47  ;;  %v871_v63 = vpop.permute.xlu2 %243 }
  0x7c   :  { %173 = vmatmul.f32.gmra.mxu2 %v119_v48  ;;  %v274_v6 = vpop.permute.xlu2 %273 }
  0x7d   :  { %v302_v32 = vadd.f32 %v882_v11, %v274_v6 }
  0x81   :  { %v863_v56 = vpop.permute.xlu0 %218 }
  0x82   :  { %v291_v33 = vadd.f32 %v882_v11, %v863_v56 }
  0x84   :  { %v209_v10 = vpop.permute.xlu2 %208 }
  0x85   :  { %v875_v8 = vpop.permute.xlu1 %228  ;;  %v289_v13 = vadd.f32 %v882_v11, %v209_v10 }
  0x86   :  { %v293_v7 = vadd.f32 %v882_v11, %v875_v8 }
  0x89   :  { %v865_v57 = vpop.permute.xlu0 %223 }
  0x8a   :  { %v292_v55 = vadd.f32 %v882_v11, %v865_v57 }
  0x8c   :  { %v214_v18 = vpop.permute.xlu2 %213 }
  0x8d   :  { %v234_v12 = vpop.permute.xlu1 %233  ;;  %v290_v22 = vadd.f32 %v882_v11, %v214_v18 }
  0x8e   :  { %v294_v57 = vadd.f32 %v882_v11, %v234_v12  ;;  %v295_v12 = vadd.f32 %v882_v11, %v867_v58  ;;  %v296_v58 = vadd.f32 %v882_v11, %v871_v63 }
  0x91   :  { %v869_v62 = vpop.permute.xlu0 %248 }
  0x95   :  { %v889_v24 = vpop.permute.xlu1 %253 }
  0x99   :  { %v873_v5 = vpop.permute.xlu0 %258 }
  0x9d   :  { %v279_v42 = vpop.permute.xlu1 %278 }
  0x9e   :  { %v303_v48 = vadd.f32 %v882_v11, %v279_v42 }
  0xa1   :  { %v877_v9 = vpop.permute.xlu0 %263 }
  0xa5   :  { %v284_v1 = vpop.permute.xlu1 %283 }
  0xa6   :  { %v304_v6 = vadd.f32 %v882_v11, %v284_v1 }
  0xa9   :  { %v269_v17 = vpop.permute.xlu0 %268 }
  0xaa   :  { %v886_v20 = vadd.f32 %v882_v11, %v269_v17 }
  0xc9   :  { %v141_v14 = vpop.f32.mrf.mxu0 }
  0xca   :  { %v305_v15 = vmul.f32 2.0, %v141_v14 }
  0xcc   :  { %v321_v16 = vsub.f32 %v289_v13, %v305_v15 }
  0xce   :  { %v337_v19 = vmax.f32 %v321_v16, 0.0 }
  0xcf   :  { %v156_v36 = vpop.f32.mrf.mxu2 }
  0xd0   :  { %v353_v21 = vmul.f32 -0.5, %v337_v19  ;;  %v177_v23 = vpop.f32.mrf.mxu3  ;;  %v310_v10 = vmul.f32 2.0, %v156_v36 }
  0xd1   :  { %v144_v25 = vpop.f32.mrf.mxu0  ;;  %v891_v26 = vmul.f32 2.0, %v177_v23 }
  0xd2   :  { %v369_v27 = vmul.f32 1.442695, %v353_v21  ;;  %v306_v28 = vmul.f32 2.0, %v144_v25  ;;  %v326_v25 = vsub.f32 %v294_v57, %v310_v10  ;;  %v299_v10 = vadd.f32 %v882_v11, %v873_v5 }
  0xd3   :  { %v333_v29 = vsub.f32 %v886_v20, %v891_v26 }
  0xd4   :  { %609 = vpow2.f32 %v369_v27  ;;  %v322_v30 = vsub.f32 %v290_v22, %v306_v28 }
  0xd6   :  { %v338_v31 = vmax.f32 %v322_v30, 0.0 }
  0xd7   :  { %v159_v60 = vpop.f32.mrf.mxu2 }
  0xd8   :  { %v354_v34 = vmul.f32 -0.5, %v338_v31  ;;  %v180_v35 = vpop.f32.mrf.mxu3  ;;  %v311_v30 = vmul.f32 2.0, %v159_v60 }
  0xd9   :  { %v147_v37 = vpop.f32.mrf.mxu0  ;;  %v318_v38 = vmul.f32 2.0, %v180_v35 }
  0xda   :  { %v610_v39 = vpop.eup %609  ;;  %v371_v40 = vmul.f32 1.442695, %v354_v34  ;;  %v307_v41 = vmul.f32 2.0, %v147_v37 }
  0xdb   :  { %v334_v43 = vsub.f32 %v302_v32, %v318_v38  ;;  %433 = vmatmul.f32.vlgmr.msrb.gmra.mxu0 %v610_v39  ;;  %v327_v38 = vsub.f32 %v295_v12, %v311_v30 }
  0xdc   :  { %611 = vpow2.f32 %v371_v40  ;;  %v323_v44 = vsub.f32 %v291_v33, %v307_v41  ;;  %v342_v33 = vmax.f32 %v326_v25, 0.0 }
  0xdd   :  { %v350_v45 = vmax.f32 %v334_v43, 0.0  ;;  %v343_v41 = vmax.f32 %v327_v38, 0.0 }
  0xde   :  { %v339_v46 = vmax.f32 %v323_v44, 0.0  ;;  %v358_v40 = vmul.f32 -0.5, %v342_v33 }
  0xdf   :  { %v366_v47 = vmul.f32 -0.5, %v350_v45  ;;  %v162_v8 = vpop.f32.mrf.mxu2 }
  0xe0   :  { %v355_v49 = vmul.f32 -0.5, %v339_v46  ;;  %v183_v50 = vpop.f32.mrf.mxu3  ;;  %v379_v43 = vmul.f32 1.442695, %v358_v40  ;;  %v312_v44 = vmul.f32 2.0, %v162_v8 }
  0xe1   :  { %v395_v51 = vmul.f32 1.442695, %v366_v47  ;;  %v150_v52 = vpop.f32.mrf.mxu0  ;;  %v319_v53 = vmul.f32 2.0, %v183_v50  ;;  %v359_v47 = vmul.f32 -0.5, %v343_v41 }
  0xe2   :  { %v612_v54 = vpop.eup %611  ;;  %v373_v56 = vmul.f32 1.442695, %v355_v49  ;;  %v308_v59 = vmul.f32 2.0, %v150_v52 }
  0xe3   :  { %613 = vpow2.f32 %v395_v51  ;;  %v335_v61 = vsub.f32 %v303_v48, %v319_v53  ;;  %436 = vmatmul.f32.gmra.mxu0 %v612_v54  ;;  %v328_v48 = vsub.f32 %v296_v58, %v312_v44  ;;  %v381_v49 = vmul.f32 1.442695, %v359_v47 }
  0xe4   :  { %615 = vpow2.f32 %v373_v56  ;;  %v324_v0 = vsub.f32 %v292_v55, %v308_v59  ;;  %v297_v54 = vadd.f32 %v882_v11, %v869_v62 }
  0xe5   :  { %v351_v2 = vmax.f32 %v335_v61, 0.0  ;;  %v344_v50 = vmax.f32 %v328_v48, 0.0 }
  0xe6   :  { %v340_v3 = vmax.f32 %v324_v0, 0.0  ;;  %v298_v0 = vadd.f32 %v882_v11, %v889_v24 }
  0xe7   :  { %v367_v4 = vmul.f32 -0.5, %v351_v2  ;;  %v165_v42 = vpop.f32.mrf.mxu2  ;;  %v360_v63 = vmul.f32 -0.5, %v344_v50 }
  0xe8   :  { %v356_v13 = vmul.f32 -0.5, %v340_v3  ;;  %v186_v14 = vpop.f32.mrf.mxu3  ;;  %v313_v51 = vmul.f32 2.0, %v165_v42 }
  0xe9   :  { %v614_v15 = vpop.eup %613  ;;  %v397_v16 = vmul.f32 1.442695, %v367_v4  ;;  %v153_v17 = vpop.f32.mrf.mxu0  ;;  %v320_v18 = vmul.f32 2.0, %v186_v14  ;;  %v383_v59 = vmul.f32 1.442695, %v360_v63 }
  0xea   :  { %v616_v19 = vpop.eup %615  ;;  %v375_v21 = vmul.f32 1.442695, %v356_v13  ;;  %v309_v22 = vmul.f32 2.0, %v153_v17  ;;  %472 = vmatmul.f32.vlgmr.msrb.gmra.mxu3 %v614_v15  ;;  %v329_v55 = vsub.f32 %v297_v54, %v313_v51 }
  0xeb   :  { %617 = vpow2.f32 %v397_v16  ;;  %v336_v23 = vsub.f32 %v304_v6, %v320_v18  ;;  %439 = vmatmul.f32.vlgmr.msra.gmra.mxu1 %v616_v19  ;;  %v300_v18 = vadd.f32 %v882_v11, %v877_v9 }
  0xec   :  { %619 = vpow2.f32 %v375_v21  ;;  %v325_v27 = vsub.f32 %v293_v7, %v309_v22  ;;  %v345_v60 = vmax.f32 %v329_v55, 0.0 }
  0xed   :  { %v352_v28 = vmax.f32 %v336_v23, 0.0 }
  0xee   :  { %v341_v31 = vmax.f32 %v325_v27, 0.0  ;;  %v361_v2 = vmul.f32 -0.5, %v345_v60  ;;  %v349_v27 = vmax.f32 %v333_v29, 0.0 }
  0xef   :  { %v368_v32 = vmul.f32 -0.5, %v352_v28  ;;  %v168_v52 = vpop.f32.mrf.mxu2 }
  0xf0   :  { %v357_v34 = vmul.f32 -0.5, %v341_v31  ;;  %v314_v61 = vmul.f32 2.0, %v168_v52  ;;  %v385_v4 = vmul.f32 1.442695, %v361_v2  ;;  %v365_v12 = vmul.f32 -0.5, %v349_v27 }
  0xf1   :  { %v618_v35 = vpop.eup %617  ;;  %v399_v36 = vmul.f32 1.442695, %v368_v32 }
  0xf2   :  { %v620_v37 = vpop.eup %619  ;;  %v377_v39 = vmul.f32 1.442695, %v357_v34  ;;  %475 = vmatmul.f32.gmra.mxu3 %v618_v35  ;;  %v330_v3 = vsub.f32 %v298_v0, %v314_v61  ;;  %v393_v9 = vmul.f32 1.442695, %v365_v12 }
  0xf3   :  { %621 = vpow2.f32 %v399_v36  ;;  %442 = vmatmul.f32.gmra.mxu1 %v620_v37 }
  0xf4   :  { %623 = vpow2.f32 %v377_v39  ;;  %v346_v6 = vmax.f32 %v330_v3, 0.0 }
  0xf5   :  { %625 = vpow2.f32 %v379_v43 }
  0xf6   :  { %627 = vpow2.f32 %v381_v49  ;;  %v362_v57 = vmul.f32 -0.5, %v346_v6 }
  0xf7   :  { %v171_v1 = vpop.f32.mrf.mxu2  ;;  %629 = vpow2.f32 %v383_v59 }
  0xf8   :  { %v315_v7 = vmul.f32 2.0, %v171_v1  ;;  %631 = vpow2.f32 %v385_v4  ;;  %v387_v15 = vmul.f32 1.442695, %v362_v57 }
  0xf9   :  { %v622_v45 = vpop.eup %621 }
  0xfa   :  { %v624_v46 = vpop.eup %623  ;;  %478 = vmatmul.f32.gmra.mxu3 %v622_v45  ;;  %v331_v13 = vsub.f32 %v299_v10, %v315_v7  ;;  %633 = vpow2.f32 %v387_v15 }
  0xfb   :  { %445 = vmatmul.f32.gmra.mxu1 %v624_v46  ;;  %v626_v53 = vpop.eup %625 }
  0xfc   :  { %v628_v56 = vpop.eup %627  ;;  %v347_v16 = vmax.f32 %v331_v13, 0.0 }
  0xfd   :  { %v630_v62 = vpop.eup %629 }
  0xfe   :  { %v632_v17 = vpop.eup %631  ;;  %v363_v19 = vmul.f32 -0.5, %v347_v16 }
  0xff   :  { %v174_v14 = vpop.f32.mrf.mxu2 }
 0x100   :  { %v316_v24 = vmul.f32 2.0, %v174_v14  ;;  %v389_v22 = vmul.f32 1.442695, %v363_v19  ;;  %v634_v25 = vpop.eup %633 }
 0x102   :  { %v332_v21 = vsub.f32 %v300_v18, %v316_v24  ;;  %635 = vpow2.f32 %v389_v22 }
 0x103   :  { %448 = vmatmul.f32.gmra.mxu1 %v626_v53 }
 0x104   :  { %v348_v23 = vmax.f32 %v332_v21, 0.0 }
 0x106   :  { %v364_v5 = vmul.f32 -0.5, %v348_v23 }
 0x108   :  { %v391_v8 = vmul.f32 1.442695, %v364_v5  ;;  %v636_v28 = vpop.eup %635 }
 0x10a   :  { %637 = vpow2.f32 %v391_v8 }
 0x10b   :  { %451 = vmatmul.f32.gmra.mxu1 %v628_v56  ;;  %639 = vpow2.f32 %v393_v9 }
 0x110   :  { %v638_v11 = vpop.eup %637 }
 0x111   :  { %v640_v30 = vpop.eup %639 }
 0x113   :  { %454 = vmatmul.f32.gmra.mxu1 %v630_v62 }
 0x11b   :  { %457 = vmatmul.f32.gmra.mxu1 %v632_v17 }
 0x123   :  { %460 = vmatmul.f32.gmra.mxu1 %v634_v25 }
 0x12b   :  { %463 = vmatmul.f32.gmra.mxu1 %v636_v28 }
 0x133   :  { %466 = vmatmul.f32.gmra.mxu1 %v638_v11 }
 0x13b   :  { %469 = vmatmul.f32.gmra.mxu1 %v640_v30 }
 0x158   :  { %v434_v31 = vpop.f32.mrf.mxu0 }
 0x159   :  { %498 = vst [vmem:[#allocation7] sm:$0xff] %v434_v31 }
 0x160   :  { %v437_v32 = vpop.f32.mrf.mxu0 }
 0x161   :  { %499 = vst [vmem:[#allocation7 + $0x8] sm:$0xff] %v437_v32 }
 0x168   :  { %v440_v33 = vpop.f32.mrf.mxu1 }
 0x169   :  { %500 = vst [vmem:[#allocation7 + $0x10] sm:$0xff] %v440_v33 }
 0x16d   :  { %v473_v34 = vpop.f32.mrf.mxu3 }
 0x16e   :  { %511 = vst [vmem:[#allocation7 + $0x68] sm:$0xff] %v473_v34 }
 0x170   :  { %v443_v20 = vpop.f32.mrf.mxu1 }
 0x171   :  { %501 = vst [vmem:[#allocation7 + $0x18] sm:$0xff] %v443_v20 }
 0x175   :  { %v476_v26 = vpop.f32.mrf.mxu3 }
 0x176   :  { %512 = vst [vmem:[#allocation7 + $0x70] sm:$0xff] %v476_v26 }
 0x178   :  { %v446_v29 = vpop.f32.mrf.mxu1 }
 0x179   :  { %502 = vst [vmem:[#allocation7 + $0x20] sm:$0xff] %v446_v29 }
 0x17d   :  { %v479_v35 = vpop.f32.mrf.mxu3 }
 0x17e   :  { %513 = vst [vmem:[#allocation7 + $0x78] sm:$0xff] %v479_v35 }
 0x180   :  { %v449_v36 = vpop.f32.mrf.mxu1 }
 0x181   :  { %503 = vst [vmem:[#allocation7 + $0x28] sm:$0xff] %v449_v36 }
 0x188   :  { %v452_v37 = vpop.f32.mrf.mxu1 }
 0x189   :  { %504 = vst [vmem:[#allocation7 + $0x30] sm:$0xff] %v452_v37 }
 0x190   :  { %v455_v38 = vpop.f32.mrf.mxu1 }
 0x191   :  { %505 = vst [vmem:[#allocation7 + $0x38] sm:$0xff] %v455_v38 }
 0x198   :  { %v458_v39 = vpop.f32.mrf.mxu1 }
 0x199   :  { %506 = vst [vmem:[#allocation7 + $0x40] sm:$0xff] %v458_v39 }
 0x1a0   :  { %v461_v40 = vpop.f32.mrf.mxu1 }
 0x1a1   :  { %507 = vst [vmem:[#allocation7 + $0x48] sm:$0xff] %v461_v40 }
 0x1a8   :  { %v464_v41 = vpop.f32.mrf.mxu1 }
 0x1a9   :  { %508 = vst [vmem:[#allocation7 + $0x50] sm:$0xff] %v464_v41 }
 0x1b0   :  { %v467_v42 = vpop.f32.mrf.mxu1 }
 0x1b1   :  { %509 = vst [vmem:[#allocation7 + $0x58] sm:$0xff] %v467_v42 }
 0x1b8   :  { %v470_v58 = vpop.f32.mrf.mxu1 }
 0x1b9   :  { %510 = vst [vmem:[#allocation7 + $0x60] sm:$0xff] %v470_v58 }
 0x1ba   :  { %526 = dma.vmem_to_hbm [thread:$0]  %s519_s17, 2048, %s521_s20, [#allocation4], %s720_s26, %s720_s26, %s721_s27  }
 0x1bb   :  { %717 = dma.done.wait [#allocation4], 2048  }
 0x1bc   :  { %718 = vsyncadd [#allocation4], 4294965248 }
 0x1bd   :  { %531 = vsyncpa [#allocation3], 1 }
 0x1be   :  { %532 = vsyncpa [#allocation6], 1 }
 0x1bf   :  { %533 = vsyncpa [#allocation4], 1 }

</bundles_post_ra>
